<compile_context>
chip_gen: v5e
topology: v5e:2x2
jax: 0.10.0
libtpu: 0.0.40
codegen_flags: <defaults>
</compile_context>

<pallas_src>
import jax
import jax.numpy as jnp
from jax.experimental import pallas as pl
from jax.experimental.pallas import tpu as pltpu


_TARGET_BLOCK_BYTES = 2 * 1024 * 1024   # ~2 MiB block -> ~8 MiB pipelined (in+out, x2 buffers)
_VMEM_LIMIT_BYTES = 32 * 1024 * 1024    # safe on v5e/v6e (128 MiB phys) and v7x (64 MiB phys)
_LANE = 128


def _identity_kernel(x_ref, o_ref):
    # Pure pass-through copy of the current tile.
    o_ref[...] = x_ref[...]


def _lane_dense_2d(x):
    """Reshape to 2D with a lane-dense (multiple-of-128) last dim when possible."""
    if x.ndim == 0:
        return x.reshape(1, 1)
    total = x.size
    # Prefer a wide, 128-multiple lane dimension (unmasked full-lane stores).
    for lanes in (2048, 1024, 512, 256, _LANE):
        if total % lanes == 0:
            return x.reshape(total // lanes, lanes)
    # Fallback: keep the original trailing dim (full-extent block, masked stores).
    return x.reshape(-1, x.shape[-1])


def _sublane_multiple(dtype) -> int:
    # f32 -> 8, bf16/f16 -> 16, int8/fp8 -> 32 (sub-32-bit dtypes pack along sublanes).
    return max(8, 32 // jnp.dtype(dtype).itemsize)


def identity(x: jax.Array) -> jax.Array:
    """Pallas identity: forward(x) = x (alias-friendly streamed copy)."""
    orig_shape = x.shape
    x2 = _lane_dense_2d(x)
    M, N = x2.shape
    itemsize = jnp.dtype(x2.dtype).itemsize
    sub = _sublane_multiple(x2.dtype)

    # Byte-targeted row tile: big enough to amortize the ~0.35us per-step
    # overhead, small enough that the double-buffered in+out pipeline fits
    # the scoped VMEM limit on all generations.
    if M <= sub:
        tm = M  # full-extent leading dim is always legal
    else:
        rows = _TARGET_BLOCK_BYTES // max(N * itemsize, 1)
        rows = (rows // sub) * sub
        tm = int(max(sub, min(rows, M)))

    grid = (pl.cdiv(M, tm),)

    out2 = pl.pallas_call(
        _identity_kernel,
        out_shape=jax.ShapeDtypeStruct((M, N), x2.dtype),
        grid_spec=pltpu.PrefetchScalarGridSpec(
            num_scalar_prefetch=0,
            grid=grid,
            in_specs=[pl.BlockSpec((tm, N), lambda i: (i, 0))],
            out_specs=pl.BlockSpec((tm, N), lambda i: (i, 0)),
        ),
        compiler_params=pltpu.CompilerParams(
            dimension_semantics=("parallel",),   # shards grid across v7x's 2 TCs
            vmem_limit_bytes=_VMEM_LIMIT_BYTES,
        ),
        cost_estimate=pl.CostEstimate(
            flops=0,
            transcendentals=0,
            bytes_accessed=2 * M * N * itemsize,
        ),
        # Output reuses the input HBM buffer when the caller donates it under
        # jit; identity then allocates no second HBM array.
        input_output_aliases={0: 0},
    )(x2)

    return out2.reshape(orig_shape)


if __name__ == "__main__":
    key = jax.random.PRNGKey(0)
    x = jax.random.normal(key, (2, 4, 16, 16), dtype=jnp.float32)  # NCHW
    y = identity(x)
    jax.block_until_ready(y)
    assert y.shape == x.shape and y.dtype == x.dtype
    assert bool(jnp.all(y == x))
    print("KERNEL_OK")
</pallas_src>

<mosaic_0001>
module attributes {stable_mosaic.version = 11 : i64} {
  func.func @_identity_kernel(%arg0: i32, %arg1: memref<1x2048xf32, #tpu.memory_space<vmem>>, %arg2: memref<1x2048xf32, #tpu.memory_space<vmem>>) attributes {dimension_semantics = [#tpu.dimension_semantics<parallel>], iteration_bounds = array<i64: 1>, scalar_prefetch = 0 : i64, scratch_operands = 0 : i64, tpu.core_type = #tpu.core_type<tc>, window_params = [{transform_indices = @transform_0, window_bounds = array<i64: 1, 2048>}, {transform_indices = @transform_1, window_bounds = array<i64: 1, 2048>}]} {
    %c0 = arith.constant 0 : index
    %c0_0 = arith.constant 0 : index
    %0 = vector.load %arg1[%c0, %c0_0] : memref<1x2048xf32, #tpu.memory_space<vmem>>, vector<1x2048xf32>
    %c0_1 = arith.constant 0 : index
    %c0_2 = arith.constant 0 : index
    %1 = vector.load %arg2[%c0_1, %c0_2] : memref<1x2048xf32, #tpu.memory_space<vmem>>, vector<1x2048xf32>
    tpu.vector_store %arg2[%c0_1, %c0_2], %0 {strides = array<i32>} : memref<1x2048xf32, #tpu.memory_space<vmem>>, vector<1x2048xf32>,
    return
  }
  func.func @transform_0(%arg0: i32) -> (i32, i32) {
    %c0_i32 = arith.constant 0 : i32
    %c0_i32_0 = arith.constant 0 : i32
    return %arg0, %c0_i32 : i32, i32
  }
  func.func @transform_1(%arg0: i32) -> (i32, i32) {
    %c0_i32 = arith.constant 0 : i32
    %c0_i32_0 = arith.constant 0 : i32
    return %arg0, %c0_i32 : i32, i32
  }
}

</mosaic_0001>

<bundles_post_ra>
// kernel: tpu_custom_call.1
= control target key start
LH: loop header
LB: loop body
LE: loop exit
PB: predicated region body
PF: predicated region fallthrough
CT: control target
= control target key end

     0   :  { %6 = vsyncpa [#allocation3], 0  ;;  %s116_s0 = inlined_call_operand.hbm [shape: f32[1,2048], index: 0, kind: input, shape index: {}, may-alias: {0,1}]   ;;  %s117_s1 = inlined_call_operand.hbm [shape: f32[1,2048], index: 1, kind: output, shape index: {}, may-alias: {0,1}]  }
   0x1   :  { %7 = vsyncpa [#allocation4], 0  ;;  %s13_s8 = sshll.u32 %s116_s0, 4  ;;  %s98_s9 = smov [#allocation2]   ;;  %s14_s8 = int_to_ptr.hbm [resolvable:$true] %s13_s8 }
   0x2   :  { %s15_s10 = sshll.u32 %s98_s9, 4  ;;  %s16_s10 = int_to_ptr.vmem [resolvable:$true] %s15_s10 }
   0x3   :  { %18 = dma.hbm_to_vmem [thread:$0]  %s14_s8, 256, %s16_s10, [#allocation3]  }
   0x4   :  { %94 = dma.done.wait [#allocation3], 256  }
   0x5   :  { %95 = vsyncadd [#allocation3], 4294967040  ;;  %s99_s11 = smov [#allocation5]   ;;  %s34_s15 = sshll.u32 %s117_s1, 4  ;;  %v23_v0 = vld [vmem:[#allocation2] sm:$0xff]  ;;  %v24_v1 = vld [vmem:[#allocation2 + $0x8] sm:$0xff]  ;;  %s35_s15 = int_to_ptr.hbm [resolvable:$true] %s34_s15 }
   0x6   :  { %s32_s12 = sshll.u32 %s99_s11, 4  ;;  %25 = vst [vmem:[#allocation5] sm:$0xff] %v23_v0  ;;  %s33_s12 = int_to_ptr.vmem [resolvable:$true] %s32_s12 }
   0x7   :  { %26 = vst [vmem:[#allocation5 + $0x8] sm:$0xff] %v24_v1 }
   0x8   :  { %37 = dma.vmem_to_hbm [thread:$0]  %s33_s12, 256, %s35_s15, [#allocation4]  }
   0x9   :  { %96 = dma.done.wait [#allocation4], 256  }
   0xa   :  { %97 = vsyncadd [#allocation4], 4294967040 }
   0xb   :  { %42 = vsyncpa [#allocation3], 1 }
   0xc   :  { %43 = vsyncpa [#allocation4], 1 }

</bundles_post_ra>
